<compile_context>
chip_gen: v5e
topology: v5e:2x2
jax: 0.10.0
libtpu: 0.0.40
codegen_flags: <defaults>
</compile_context>

<pallas_src>
import math

import jax
import jax.numpy as jnp
from jax.experimental import pallas as pl
from jax.experimental.pallas import tpu as pltpu


def _sinusoidal_pe(T, F, dtype):
    """Exact port of the PyTorch buffer computation (f32, cast once)."""
    position = jnp.arange(T, dtype=jnp.float32)[:, None]
    div_term = jnp.exp(jnp.arange(0, F, 2, dtype=jnp.float32)
                       * (-math.log(10000.0) / F))
    pe = jnp.zeros((T, F), jnp.float32)
    pe = pe.at[:, 0::2].set(jnp.sin(position * div_term))
    pe = pe.at[:, 1::2].set(jnp.cos(position * div_term)[:, : F // 2])
    return pe.astype(dtype)


def _choose_blocks(B, N, itemsize, target_bytes=2 << 20):
    """Pick (row_block, col_block) obeying the (8, 128) rule, ~target_bytes."""
    # Column (lane) block: full row if it fits, else a multiple of 128.
    if N <= 128 or N * itemsize * min(B, 8) <= target_bytes:
        ct = N
    else:
        ct = max(128, (target_bytes // (itemsize * min(B, 8))) // 128 * 128)
    # Row (sublane) block: full B, or a multiple of 8.
    if B <= 8:
        bt = B
    else:
        rows = max(1, target_bytes // (ct * itemsize))
        bt = B if rows >= B else max(8, (rows // 8) * 8)
    return bt, ct


def make_positional_encoding(dropout_p=0.1, training=False):
    """Returns fn(x, seed) implementing PositionalEncoding.forward for (B,T,F) x."""

    drop_threshold = min(int(dropout_p * (1 << 32)), (1 << 32) - 1)
    keep_scale = 1.0 / (1.0 - dropout_p) if dropout_p < 1.0 else 0.0

    def kernel(seed_ref, x_ref, pe_ref, o_ref):
        # x_ref: (bt, ct), pe_ref: (1, ct) resident slab, broadcast add.
        y = x_ref[...] + pe_ref[...]
        if training and dropout_p > 0.0:
            # Inverted dropout via HW PRNG; distinct stream per tile.
            # TODO(synk): mask differs from torch's RNG stream (same semantics).
            pltpu.prng_seed(seed_ref[0], pl.program_id(0), pl.program_id(1))
            bits = pltpu.bitcast(pltpu.prng_random_bits(y.shape), jnp.uint32)
            keep = bits >= jnp.uint32(drop_threshold)
            y = jnp.where(keep, y * jnp.asarray(keep_scale, y.dtype),
                          jnp.zeros_like(y))
        o_ref[...] = y

    def fn(x, seed=0):
        B, T, F = x.shape
        N = T * F
        itemsize = jnp.dtype(x.dtype).itemsize
        bt, ct = _choose_blocks(B, N, itemsize)

        pe = _sinusoidal_pe(T, F, x.dtype).reshape(1, N)
        x2 = x.reshape(B, N)
        seed_arr = jnp.asarray([seed], dtype=jnp.int32)

        grid = (pl.cdiv(B, bt), pl.cdiv(N, ct))
        cost = pl.CostEstimate(
            flops=B * N,
            transcendentals=0,
            bytes_accessed=(2 * B * N + N) * itemsize)

        # in/out double-buffered blocks + resident PE slab, with headroom.
        vmem_need = 4 * bt * ct * itemsize + 2 * ct * itemsize + (2 << 20)
        vmem_limit = min(max(32 << 20, 2 * vmem_need), 64 << 20)

        out = pl.pallas_call(
            kernel,
            out_shape=jax.ShapeDtypeStruct((B, N), x.dtype),
            grid_spec=pltpu.PrefetchScalarGridSpec(
                num_scalar_prefetch=1,
                grid=grid,
                in_specs=[
                    pl.BlockSpec((bt, ct), lambda i, j, seed: (i, j)),
                    # Constant row index -> the PE slab stays VMEM-resident.
                    pl.BlockSpec((1, ct), lambda i, j, seed: (0, j)),
                ],
                out_specs=pl.BlockSpec((bt, ct), lambda i, j, seed: (i, j)),
            ),
            compiler_params=pltpu.CompilerParams(
                dimension_semantics=("parallel", "parallel"),
                vmem_limit_bytes=vmem_limit),
            cost_estimate=cost,
        )(seed_arr, x2, pe)
        return out.reshape(B, T, F)

    return fn


def _reference(x):
    """Pure-JAX reference of the PyTorch forward in eval mode."""
    _, T, F = x.shape
    return x + _sinusoidal_pe(T, F, jnp.float32)[None, :, :]


if __name__ == "__main__":
    key = jax.random.PRNGKey(0)
    pos_enc = make_positional_encoding(dropout_p=0.1, training=False)

    # Primary small test shape (batch=2, seq=8, hidden=32).
    B, T, F = 2, 8, 32
    x = jax.random.normal(key, (B, T, F), dtype=jnp.float32)
    y = jax.block_until_ready(pos_enc(x, seed=0))
    assert y.shape == x.shape and y.dtype == x.dtype
    assert jnp.allclose(y, _reference(x), atol=1e-5, rtol=1e-5)

    # Secondary shape exercising non-128-multiple lane width and B > 2.
    x2 = jax.random.normal(jax.random.PRNGKey(1), (3, 5, 6), dtype=jnp.float32)
    y2 = jax.block_until_ready(pos_enc(x2, seed=0))
    assert jnp.allclose(y2, _reference(x2), atol=1e-5, rtol=1e-5)

    print("KERNEL_OK")
</pallas_src>

<mosaic_0001>
module attributes {stable_mosaic.version = 11 : i64} {
  func.func @kernel(%arg0: i32, %arg1: i32, %arg2: memref<1xi32, #tpu.memory_space<smem>>, %arg3: memref<2x256xf32, #tpu.memory_space<vmem>>, %arg4: memref<1x256xf32, #tpu.memory_space<vmem>>, %arg5: memref<2x256xf32, #tpu.memory_space<vmem>>) attributes {dimension_semantics = [#tpu.dimension_semantics<parallel>, #tpu.dimension_semantics<parallel>], iteration_bounds = array<i64: 1, 1>, scalar_prefetch = 1 : i64, scratch_operands = 0 : i64, tpu.core_type = #tpu.core_type<tc>, window_params = [{transform_indices = @transform_0, window_bounds = array<i64: 2, 256>}, {transform_indices = @transform_1, window_bounds = array<i64: 1, 256>}, {transform_indices = @transform_2, window_bounds = array<i64: 2, 256>}]} {
    %c0 = arith.constant 0 : index
    %c0_0 = arith.constant 0 : index
    %0 = vector.load %arg3[%c0, %c0_0] : memref<2x256xf32, #tpu.memory_space<vmem>>, vector<2x256xf32>
    %c0_1 = arith.constant 0 : index
    %c0_2 = arith.constant 0 : index
    %1 = vector.load %arg4[%c0_1, %c0_2] : memref<1x256xf32, #tpu.memory_space<vmem>>, vector<1x256xf32>
    %2 = vector.broadcast %1 : vector<1x256xf32> to vector<2x256xf32>
    %3 = arith.addf %0, %2 : vector<2x256xf32>
    %c0_3 = arith.constant 0 : index
    %c0_4 = arith.constant 0 : index
    %4 = vector.load %arg5[%c0_3, %c0_4] : memref<2x256xf32, #tpu.memory_space<vmem>>, vector<2x256xf32>
    tpu.vector_store %arg5[%c0_3, %c0_4], %3 {strides = array<i32>} : memref<2x256xf32, #tpu.memory_space<vmem>>, vector<2x256xf32>,
    return
  }
  func.func @transform_0(%arg0: i32, %arg1: i32, %arg2: memref<1xi32, #tpu.memory_space<smem>>) -> (i32, i32) {
    %c0_i32 = arith.constant 0 : i32
    return %arg0, %arg1 : i32, i32
  }
  func.func @transform_1(%arg0: i32, %arg1: i32, %arg2: memref<1xi32, #tpu.memory_space<smem>>) -> (i32, i32) {
    %c0_i32 = arith.constant 0 : i32
    %c0_i32_0 = arith.constant 0 : i32
    return %c0_i32, %arg1 : i32, i32
  }
  func.func @transform_2(%arg0: i32, %arg1: i32, %arg2: memref<1xi32, #tpu.memory_space<smem>>) -> (i32, i32) {
    %c0_i32 = arith.constant 0 : i32
    return %arg0, %arg1 : i32, i32
  }
}

</mosaic_0001>

<bundles_post_ra>
// kernel: tpu_custom_call.1
= control target key start
LH: loop header
LB: loop body
LE: loop exit
PB: predicated region body
PF: predicated region fallthrough
CT: control target
= control target key end

     0   :  { %9 = vsyncpa [#allocation5], 0  ;;  %s141_s0 = inlined_call_operand.<no memory space> [shape: s32[1], index: 0, kind: input, shape index: {}]   ;;  %s142_s1 = inlined_call_operand.hbm [shape: f32[2,256], index: 1, kind: input, shape index: {}]   ;;  %s143_s2 = inlined_call_operand.vmem [shape: f32[1,256], index: 2, kind: input, shape index: {}]   ;;  %s144_s3 = inlined_call_operand.hbm [shape: f32[2,256], index: 3, kind: output, shape index: {}]  }
   0x1   :  { %10 = vsyncpa [#allocation6], 0  ;;  %s16_s14 = sshll.u32 %s142_s1, 4  ;;  %s110_s15 = smov [#allocation4]   ;;  %s17_s14 = int_to_ptr.hbm [resolvable:$true] %s16_s14 }
   0x2   :  { %s18_s16 = sshll.u32 %s110_s15, 4  ;;  %s19_s16 = int_to_ptr.vmem [resolvable:$true] %s18_s16 }
   0x3   :  { %21 = dma.hbm_to_vmem [thread:$0]  %s17_s14, 64, %s19_s16, [#allocation5]  }
   0x4   :  { %106 = dma.done.wait [#allocation5], 64  }
   0x5   :  { %107 = vsyncadd [#allocation5], 4294967232  ;;  %v29_v0 = vld [vmem:[%s143_s2] sm:$0x3]  ;;  %vm34_vm0 = vcmask 1041408   ;;  %s111_s18 = smov [#allocation7]  }
   0x6   :  { %v31_v1 = vperm.slane %v29_v0, 0  ;;  %v32_v2 = vperm.slane %v29_v0, 1  ;;  %v28_v3 = vld [vmem:[#allocation4] sm:$0xf]  ;;  %s44_s19 = sshll.u32 %s111_s18, 4  ;;  %s46_s21 = sshll.u32 %s144_s3, 4  ;;  %s45_s19 = int_to_ptr.vmem [resolvable:$true] %s44_s19  ;;  %s47_s21 = int_to_ptr.hbm [resolvable:$true] %s46_s21 }
   0x8   :  { %v33_v4 = vrot.slane %v32_v2, 6 }
   0xa   :  { %v35_v5 = vsel %vm34_vm0, %v31_v1, %v33_v4 }
   0xb   :  { %v37_v6 = vadd.f32 %v35_v5, %v28_v3 }
   0xd   :  { %38 = vst [vmem:[#allocation7] sm:$0xf] %v37_v6 }
   0xe   :  { %49 = dma.vmem_to_hbm [thread:$0]  %s45_s19, 64, %s47_s21, [#allocation6]  }
   0xf   :  { %108 = dma.done.wait [#allocation6], 64  }
  0x10   :  { %109 = vsyncadd [#allocation6], 4294967232 }
  0x11   :  { %54 = vsyncpa [#allocation5], 1 }
  0x12   :  { %55 = vsyncpa [#allocation6], 1 }

</bundles_post_ra>
